<compile_context>
chip_gen: v6e
topology: v6e:2x2x1
jax: 0.10.0
libtpu: 0.0.40
codegen_flags: <defaults>
</compile_context>

<pallas_src>
import jax
import jax.numpy as jnp
from jax.experimental import pallas as pl
from jax.experimental.pallas import tpu as pltpu


_EPS = 1e-12                    # torch.nn.functional.normalize default eps
_ROW_ALIGN = 32                 # row-tile multiple (covers f32/bf16/int8 sublane packing)
_TARGET_BLOCK_BYTES = 2 << 20   # ~2 MiB per input block (1-4 MiB roofline knee)


def _round_up(n, m):
    return ((n + m - 1) // m) * m


def _instance_loss_kernel(x_ref, y_ref, o_ref):
    x = x_ref[...].astype(jnp.float32)
    y = y_ref[...].astype(jnp.float32)

    # Fused normalize: loss = 2 - 2 * sxy * rsqrt(sxx) * rsqrt(syy).
    sxx = jnp.sum(x * x, axis=-1)      # [TB]
    syy = jnp.sum(y * y, axis=-1)      # [TB]
    sxy = jnp.sum(x * y, axis=-1)      # [TB]

    # 1 / max(||v||, eps) == rsqrt(max(||v||^2, eps^2))  (EUP slot, ~free).
    eps2 = jnp.float32(_EPS * _EPS)
    inv_x = jax.lax.rsqrt(jnp.maximum(sxx, eps2))
    inv_y = jax.lax.rsqrt(jnp.maximum(syy, eps2))

    loss = 2.0 - 2.0 * sxy * inv_x * inv_y          # [TB], f32
    # Lane-dense store: one (1, TB) row per grid step instead of a (TB, 1) column.
    o_ref[...] = loss.reshape(1, -1).astype(o_ref.dtype)


def _vmem_cap_bytes():
    """~75% of this chip's physical VMEM (conservative 48 MiB if unknown)."""
    try:
        phys = int(pltpu.get_tpu_info().vmem_capacity_bytes)
    except Exception:
        phys = 64 << 20          # v7x has the smallest VMEM; assume the worst
    return (phys * 3) // 4


def _vmem_footprint(tb, d_pad, in_itemsize, out_itemsize):
    in_bufs = 2 * 2 * tb * d_pad * in_itemsize             # 2 inputs x double buffer
    f32_tmp = 3 * tb * d_pad * 4                            # x*x, y*y, x*y worst case
    if in_itemsize < 4:
        f32_tmp += 2 * tb * d_pad * 4                       # f32 upcasts of x and y
    out_bufs = 2 * 8 * _round_up(tb, 128) * out_itemsize    # (1,TB) padded to (8,TB)
    return in_bufs + f32_tmp + out_bufs


def _plan_tiles(batch, d, in_itemsize, out_itemsize, vmem_cap):
    """Pick TB (rows per block): MiB-scale lane-padded blocks that fit the VMEM cap."""
    d_pad = _round_up(d, 128)                                # lane padding of the block
    tb = _TARGET_BLOCK_BYTES // (d_pad * in_itemsize)
    tb = max(_ROW_ALIGN, (tb // _ROW_ALIGN) * _ROW_ALIGN)
    tb = min(tb, _round_up(max(batch, 1), _ROW_ALIGN))       # never (much) more than B
    while (tb > _ROW_ALIGN and
           _vmem_footprint(tb, d_pad, in_itemsize, out_itemsize) + (4 << 20) > vmem_cap):
        tb = max(_ROW_ALIGN, (tb // 2 // _ROW_ALIGN) * _ROW_ALIGN)
    # TODO(synk): for very large D (TB pinned at the minimum and still over the cap)
    # add a second "arbitrary" grid axis over D with partial-sum scratch + pl.when.
    return tb, _vmem_footprint(tb, d_pad, in_itemsize, out_itemsize)


def instance_loss(x, y):
    """Pallas equivalent of InstanceLoss.forward (L2-normalize + cosine on dim=-1)."""
    assert x.shape == y.shape and x.ndim >= 1
    lead_shape = x.shape[:-1]
    D = x.shape[-1]
    out_dtype = jnp.result_type(x.dtype, y.dtype)

    x2 = x.reshape(-1, D)
    y2 = y.reshape(-1, D)
    B = x2.shape[0]

    in_itemsize = max(jnp.dtype(x.dtype).itemsize, jnp.dtype(y.dtype).itemsize)
    out_itemsize = jnp.dtype(out_dtype).itemsize
    vmem_cap = _vmem_cap_bytes()
    TB, footprint = _plan_tiles(B, D, in_itemsize, out_itemsize, vmem_cap)
    num_tiles = -(-B // TB)          # ragged tail handled by Pallas block clipping

    vmem_limit = int(min(max(footprint + (4 << 20), 16 << 20), vmem_cap))

    def call(dim_sem):
        return pl.pallas_call(
            _instance_loss_kernel,
            out_shape=jax.ShapeDtypeStruct((num_tiles, TB), out_dtype),
            grid=(num_tiles,),
            in_specs=[
                pl.BlockSpec((TB, D), lambda i: (i, 0)),
                pl.BlockSpec((TB, D), lambda i: (i, 0)),
            ],
            out_specs=pl.BlockSpec((1, TB), lambda i: (i, 0)),
            compiler_params=pltpu.CompilerParams(
                dimension_semantics=(dim_sem,),
                vmem_limit_bytes=vmem_limit,
            ),
        )(x2, y2)

    try:
        # CORE_PARALLEL shards batch tiles across both v7x TensorCores; harmless
        # on single-TC v5e/v6e.  Fall back to plain "parallel" if rejected.
        out = call(getattr(pltpu, "CORE_PARALLEL", "parallel"))
    except Exception:
        out = call("parallel")

    return out.reshape(-1)[:B].reshape(lead_shape)


def _reference(x, y):
    xn = x / jnp.maximum(jnp.linalg.norm(x, axis=-1, keepdims=True), _EPS)
    yn = y / jnp.maximum(jnp.linalg.norm(y, axis=-1, keepdims=True), _EPS)
    return 2.0 - 2.0 * jnp.sum(xn * yn, axis=-1)


if __name__ == "__main__":
    key = jax.random.PRNGKey(0)
    k1, k2, k3, k4 = jax.random.split(key, 4)

    # Case 1: [B, D] feature vectors (the module's typical usage); B not tile-aligned
    # so the ragged (clipped) tail-block path is exercised.
    B, D = 8, 32
    x = jax.random.normal(k1, (B, D), dtype=jnp.float32)
    y = jax.random.normal(k2, (B, D), dtype=jnp.float32)
    loss = instance_loss(x, y)
    jax.block_until_ready(loss)
    assert loss.shape == (B,)
    assert jnp.allclose(loss, _reference(x, y), atol=1e-5, rtol=1e-5)

    # Case 2: extra leading dims (normalize/sum still over the last dim).
    x3 = jax.random.normal(k3, (2, 5, 64), dtype=jnp.float32)
    y3 = jax.random.normal(k4, (2, 5, 64), dtype=jnp.float32)
    loss3 = instance_loss(x3, y3)
    jax.block_until_ready(loss3)
    assert loss3.shape == (2, 5)
    assert jnp.allclose(loss3, _reference(x3, y3), atol=1e-5, rtol=1e-5)

    print("KERNEL_OK")
</pallas_src>

<mosaic_0001>
module attributes {stable_mosaic.version = 11 : i64} {
  func.func @_instance_loss_kernel(%arg0: i32, %arg1: memref<32x32xf32, #tpu.memory_space<vmem>>, %arg2: memref<32x32xf32, #tpu.memory_space<vmem>>, %arg3: memref<1x32xf32, #tpu.memory_space<vmem>>) attributes {dimension_semantics = [#tpu.dimension_semantics<core_parallel>], iteration_bounds = array<i64: 1>, scalar_prefetch = 0 : i64, scratch_operands = 0 : i64, tpu.core_type = #tpu.core_type<tc>, window_params = [{transform_indices = @transform_0, window_bounds = array<i64: 32, 32>}, {transform_indices = @transform_1, window_bounds = array<i64: 32, 32>}, {transform_indices = @transform_2, window_bounds = array<i64: 1, 32>}]} {
    %c0 = arith.constant 0 : index
    %c0_0 = arith.constant 0 : index
    %0 = vector.load %arg1[%c0, %c0_0] : memref<32x32xf32, #tpu.memory_space<vmem>>, vector<32x32xf32>
    %c0_1 = arith.constant 0 : index
    %c0_2 = arith.constant 0 : index
    %1 = vector.load %arg2[%c0_1, %c0_2] : memref<32x32xf32, #tpu.memory_space<vmem>>, vector<32x32xf32>
    %2 = arith.mulf %0, %0 : vector<32x32xf32>
    %cst = arith.constant dense<0.000000e+00> : vector<32xf32>
    %3 = vector.multi_reduction <add>, %2, %cst [1] : vector<32x32xf32> to vector<32xf32>
    %4 = arith.mulf %1, %1 : vector<32x32xf32>
    %cst_3 = arith.constant dense<0.000000e+00> : vector<32xf32>
    %5 = vector.multi_reduction <add>, %4, %cst_3 [1] : vector<32x32xf32> to vector<32xf32>
    %6 = arith.mulf %0, %1 : vector<32x32xf32>
    %cst_4 = arith.constant dense<0.000000e+00> : vector<32xf32>
    %7 = vector.multi_reduction <add>, %6, %cst_4 [1] : vector<32x32xf32> to vector<32xf32>
    %cst_5 = arith.constant 1.000000e-24 : f32
    %8 = vector.broadcast %cst_5 : f32 to vector<32xf32>
    %9 = arith.maximumf %3, %8 : vector<32xf32>
    %10 = math.rsqrt %9 : vector<32xf32>
    %cst_6 = arith.constant 1.000000e-24 : f32
    %11 = vector.broadcast %cst_6 : f32 to vector<32xf32>
    %12 = arith.maximumf %5, %11 : vector<32xf32>
    %13 = math.rsqrt %12 : vector<32xf32>
    %cst_7 = arith.constant 2.000000e+00 : f32
    %14 = vector.broadcast %cst_7 : f32 to vector<32xf32>
    %15 = arith.mulf %14, %7 : vector<32xf32>
    %16 = arith.mulf %15, %10 : vector<32xf32>
    %17 = arith.mulf %16, %13 : vector<32xf32>
    %cst_8 = arith.constant 2.000000e+00 : f32
    %18 = vector.broadcast %cst_8 : f32 to vector<32xf32>
    %19 = arith.subf %18, %17 : vector<32xf32>
    %20 = vector.shape_cast %19 : vector<32xf32> to vector<1x32xf32>
    %c0_9 = arith.constant 0 : index
    %c0_10 = arith.constant 0 : index
    %21 = vector.load %arg3[%c0_9, %c0_10] : memref<1x32xf32, #tpu.memory_space<vmem>>, vector<1x32xf32>
    tpu.vector_store %arg3[%c0_9, %c0_10], %20 {strides = array<i32>} : memref<1x32xf32, #tpu.memory_space<vmem>>, vector<1x32xf32>,
    return
  }
  func.func @transform_0(%arg0: i32) -> (i32, i32) {
    %c0_i32 = arith.constant 0 : i32
    %c0_i32_0 = arith.constant 0 : i32
    return %arg0, %c0_i32 : i32, i32
  }
  func.func @transform_1(%arg0: i32) -> (i32, i32) {
    %c0_i32 = arith.constant 0 : i32
    %c0_i32_0 = arith.constant 0 : i32
    return %arg0, %c0_i32 : i32, i32
  }
  func.func @transform_2(%arg0: i32) -> (i32, i32) {
    %c0_i32 = arith.constant 0 : i32
    %c0_i32_0 = arith.constant 0 : i32
    return %arg0, %c0_i32 : i32, i32
  }
}

module attributes {stable_mosaic.version = 11 : i64} {
  func.func @_instance_loss_kernel(%arg0: i32, %arg1: memref<32x32xf32, #tpu.memory_space<vmem>>, %arg2: memref<32x32xf32, #tpu.memory_space<vmem>>, %arg3: memref<1x32xf32, #tpu.memory_space<vmem>>) attributes {dimension_semantics = [#tpu.dimension_semantics<parallel>], iteration_bounds = array<i64: 1>, scalar_prefetch = 0 : i64, scratch_operands = 0 : i64, tpu.core_type = #tpu.core_type<tc>, window_params = [{transform_indices = @transform_0, window_bounds = array<i64: 32, 32>}, {transform_indices = @transform_1, window_bounds = array<i64: 32, 32>}, {transform_indices = @transform_2, window_bounds = array<i64: 1, 32>}]} {
    %c0 = arith.constant 0 : index
    %c0_0 = arith.constant 0 : index
    %0 = vector.load %arg1[%c0, %c0_0] : memref<32x32xf32, #tpu.memory_space<vmem>>, vector<32x32xf32>
    %c0_1 = arith.constant 0 : index
    %c0_2 = arith.constant 0 : index
    %1 = vector.load %arg2[%c0_1, %c0_2] : memref<32x32xf32, #tpu.memory_space<vmem>>, vector<32x32xf32>
    %2 = arith.mulf %0, %0 : vector<32x32xf32>
    %cst = arith.constant dense<0.000000e+00> : vector<32xf32>
    %3 = vector.multi_reduction <add>, %2, %cst [1] : vector<32x32xf32> to vector<32xf32>
    %4 = arith.mulf %1, %1 : vector<32x32xf32>
    %cst_3 = arith.constant dense<0.000000e+00> : vector<32xf32>
    %5 = vector.multi_reduction <add>, %4, %cst_3 [1] : vector<32x32xf32> to vector<32xf32>
    %6 = arith.mulf %0, %1 : vector<32x32xf32>
    %cst_4 = arith.constant dense<0.000000e+00> : vector<32xf32>
    %7 = vector.multi_reduction <add>, %6, %cst_4 [1] : vector<32x32xf32> to vector<32xf32>
    %cst_5 = arith.constant 1.000000e-24 : f32
    %8 = vector.broadcast %cst_5 : f32 to vector<32xf32>
    %9 = arith.maximumf %3, %8 : vector<32xf32>
    %10 = math.rsqrt %9 : vector<32xf32>
    %cst_6 = arith.constant 1.000000e-24 : f32
    %11 = vector.broadcast %cst_6 : f32 to vector<32xf32>
    %12 = arith.maximumf %5, %11 : vector<32xf32>
    %13 = math.rsqrt %12 : vector<32xf32>
    %cst_7 = arith.constant 2.000000e+00 : f32
    %14 = vector.broadcast %cst_7 : f32 to vector<32xf32>
    %15 = arith.mulf %14, %7 : vector<32xf32>
    %16 = arith.mulf %15, %10 : vector<32xf32>
    %17 = arith.mulf %16, %13 : vector<32xf32>
    %cst_8 = arith.constant 2.000000e+00 : f32
    %18 = vector.broadcast %cst_8 : f32 to vector<32xf32>
    %19 = arith.subf %18, %17 : vector<32xf32>
    %20 = vector.shape_cast %19 : vector<32xf32> to vector<1x32xf32>
    %c0_9 = arith.constant 0 : index
    %c0_10 = arith.constant 0 : index
    %21 = vector.load %arg3[%c0_9, %c0_10] : memref<1x32xf32, #tpu.memory_space<vmem>>, vector<1x32xf32>
    tpu.vector_store %arg3[%c0_9, %c0_10], %20 {strides = array<i32>} : memref<1x32xf32, #tpu.memory_space<vmem>>, vector<1x32xf32>,
    return
  }
  func.func @transform_0(%arg0: i32) -> (i32, i32) {
    %c0_i32 = arith.constant 0 : i32
    %c0_i32_0 = arith.constant 0 : i32
    return %arg0, %c0_i32 : i32, i32
  }
  func.func @transform_1(%arg0: i32) -> (i32, i32) {
    %c0_i32 = arith.constant 0 : i32
    %c0_i32_0 = arith.constant 0 : i32
    return %arg0, %c0_i32 : i32, i32
  }
  func.func @transform_2(%arg0: i32) -> (i32, i32) {
    %c0_i32 = arith.constant 0 : i32
    %c0_i32_0 = arith.constant 0 : i32
    return %arg0, %c0_i32 : i32, i32
  }
}

</mosaic_0001>

<bundles_post_ra>
// kernel: tpu_custom_call.1
= control target key start
LH: loop header
LB: loop body
LE: loop exit
PB: predicated region body
PF: predicated region fallthrough
CT: control target
= control target key end

     0   :  { %s343_s9 = sld [smem:[#allocation0]]   ;;  %s414_s0 = inlined_call_operand.hbm [shape: f32[8,32], index: 0, kind: input, shape index: {}]   ;;  %s415_s1 = inlined_call_operand.hbm [shape: f32[8,32], index: 1, kind: input, shape index: {}]   ;;  %s416_s2 = inlined_call_operand.hbm [shape: f32[1,32], index: 2, kind: output, shape index: {}]  }
   0x1   :  { %7 = vsyncpa [#allocation3], 0 }
   0x2   :  { %8 = vsyncpa [#allocation6], 0 }
   0x3   :  { %9 = vsyncpa [#allocation4], 0 }
   0x6   :  { %s207_s10 = sshll.u32 %s343_s9, 2 }
   0x7   :  { %s13_s11 = ssub.s32 1, %s207_s10 }
   0x8   :  { %s346_s12 = sshll.u32 %s13_s11, 7 }
   0x9   :  { %s16_s13 = ssub.s32 512, %s346_s12 }
   0xa   :  { %17 = vsyncadd [#allocation3], %s16_s13  ;;  %p209_p0 = scmp.ne.s32.totalorder %s346_s12, 0  ;;  %s220_s14 = sshll.u32 %s343_s9, 9 }
   0xb   :  { %s20_s17 = scalar_lea.hbm %s414_s0, %s220_s14  ;;  %s323_s18 = smov [#allocation2]  }
   0xc   :  { %s22_s19 = sshll.u32 %s323_s18, 4  ;;  %s243_s20 = scalar_lea.hbm %s20_s17, %s346_s12  ;;  %s23_s19 = int_to_ptr.vmem [resolvable:$true] %s22_s19 }
   0xd   :  { %p244_p1 = scmp.ne.s32.totalorder %s20_s17, %s243_s20  ;;  %s247_s23 = scalar_lea.hbm %s414_s0, 128 }
   0xe   :  { %p249_p4 = scmp.lt.s32.totalorder %s247_s23, %s243_s20 }
   0xf   :  { %p245_p2 = pnand %p244_p1, %p209_p0 }
  0x11   :  { %p246_p3 = pneg %p245_p2 }
  0x13   :  { %p251_p5 = pnand %p249_p4, %p246_p3 }
  0x15   :  { %254 = shalt.err (!%p251_p5)
}
  0x16   :  { %s255_s24 = scalar_lea.vmem %s23_s19, %s346_s12  ;;  %s261_s25 = scalar_lea.vmem %s23_s19, 512 }
  0x17   :  { %p256_p6 = scmp.ne.s32.totalorder %s23_s19, %s255_s24  ;;  %p262_p9 = scmp.lt.s32.totalorder %s23_s19, %s23_s19 }
  0x18   :  { %p263_p10 = scmp.lt.s32.totalorder %s261_s25, %s255_s24 }
  0x19   :  { %p257_p7 = pnand %p256_p6, %p209_p0 }
  0x1a   :  { %p264_p11 = por %p263_p10, %p262_p9 }
  0x1b   :  { %p258_p8 = pneg %p257_p7 }
  0x1d   :  { %p265_p12 = pnand %p264_p11, %p258_p8 }
  0x1f   :  { %268 = shalt.err (!%p265_p12)
}
  0x20   :  { %s324_s26 = smov 128   ;;  %s325_s0 = smov 8  }
  0x21   :  { %28 = dma.hbm_to_vmem [thread:$0]  (%p209_p0), %s20_s17, %s346_s12, %s23_s19, [#allocation3], %s324_s26, %s324_s26, %s325_s0  }
  0x22   :  { %36 = vsyncadd [#allocation6], %s16_s13  ;;  %s39_s29 = scalar_lea.hbm %s415_s1, %s220_s14  ;;  %s326_s30 = smov [#allocation5]  }
  0x23   :  { %s41_s3 = sshll.u32 %s326_s30, 4  ;;  %s269_s4 = scalar_lea.hbm %s39_s29, %s346_s12  ;;  %s42_s3 = int_to_ptr.vmem [resolvable:$true] %s41_s3 }
  0x24   :  { %p270_p13 = scmp.ne.s32.totalorder %s39_s29, %s269_s4  ;;  %s273_s7 = scalar_lea.hbm %s415_s1, 128 }
  0x25   :  { %p275_p3 = scmp.lt.s32.totalorder %s273_s7, %s269_s4 }
  0x26   :  { %p271_p1 = pnand %p270_p13, %p209_p0 }
  0x28   :  { %p272_p2 = pneg %p271_p1 }
  0x2a   :  { %p277_p4 = pnand %p275_p3, %p272_p2 }
  0x2c   :  { %280 = shalt.err (!%p277_p4)
}
  0x2d   :  { %s281_s8 = scalar_lea.vmem %s42_s3, %s346_s12  ;;  %s287_s10 = scalar_lea.vmem %s42_s3, 512 }
  0x2e   :  { %p282_p5 = scmp.ne.s32.totalorder %s42_s3, %s281_s8  ;;  %p288_p8 = scmp.lt.s32.totalorder %s42_s3, %s42_s3 }
  0x2f   :  { %p289_p9 = scmp.lt.s32.totalorder %s287_s10, %s281_s8 }
  0x30   :  { %p283_p6 = pnand %p282_p5, %p209_p0 }
  0x31   :  { %p290_p10 = por %p289_p9, %p288_p8 }
  0x32   :  { %p284_p7 = pneg %p283_p6 }
  0x34   :  { %p291_p11 = pnand %p290_p10, %p284_p7 }
  0x36   :  { %294 = shalt.err (!%p291_p11)
}
  0x37   :  { %47 = dma.hbm_to_vmem [thread:$0]  (%p209_p0), %s39_s29, %s346_s12, %s42_s3, [#allocation6], %s324_s26, %s324_s26, %s325_s0  }
  0x38   :  { %317 = dma.done.wait [#allocation3], 512  }
  0x39   :  { %318 = vsyncadd [#allocation3], 4294966784 }
  0x3a   :  { %319 = dma.done.wait [#allocation6], 512  }
  0x3b   :  { %320 = vsyncadd [#allocation6], 4294966784  ;;  %v62_v0 = vld [vmem:[#allocation2 + $0x10] sm:$0xff]  ;;  %vm72_vm0 = vcmask 261120   ;;  %v60_v1 = vld [vmem:[#allocation2] sm:$0xff]  ;;  %v153_v48 = vlaneseq  ;;  %vm164_vm1 = vcmask 130112  }
  0x3c   :  { %v63_v2 = vld [vmem:[#allocation2 + $0x18] sm:$0xff]  ;;  %v70_v3 = vmul.f32 %v62_v0, %v62_v0  ;;  %v68_v4 = vmul.f32 %v60_v1, %v60_v1  ;;  %v61_v6 = vld [vmem:[#allocation2 + $0x8] sm:$0xff]  ;;  %v64_v9 = vld [vmem:[#allocation5] sm:$0xff]  ;;  %vm171_vm2 = vcmask 195712   ;;  %s219_s1 = sshll.u32 %s343_s9, 4  ;;  %s327_s11 = smov [#allocation7]  }
  0x3d   :  { %v71_v5 = vmul.f32 %v63_v2, %v63_v2  ;;  %v69_v7 = vmul.f32 %v61_v6, %v61_v6  ;;  %v65_v8 = vld [vmem:[#allocation5 + $0x8] sm:$0xff]  ;;  %v85_v15 = vmul.f32 %v64_v9, %v64_v9  ;;  %v67_v16 = vld [vmem:[#allocation5 + $0x18] sm:$0xff]  ;;  %v66_v17 = vld [vmem:[#allocation5 + $0x10] sm:$0xff]  ;;  %v101_v25 = vmul.f32 %v64_v9, %v60_v1  ;;  %s191_s12 = sshll.u32 %s327_s11, 4  ;;  %s189_s15 = scalar_lea.hbm %s416_s2, %s219_s1  ;;  %s192_s12 = int_to_ptr.vmem [resolvable:$true] %s191_s12 }
  0x3e   :  { %v79_v10 = vsel %vm72_vm0, %v70_v3, 0.0  ;;  %v73_v11 = vsel %vm72_vm0, %v68_v4, 0.0  ;;  %v86_v14 = vmul.f32 %v65_v8, %v65_v8  ;;  %v88_v20 = vmul.f32 %v67_v16, %v67_v16  ;;  %s295_s16 = scalar_lea.vmem %s192_s12, 16  ;;  %s299_s17 = scalar_lea.vmem %s192_s12, 32 }
  0x3f   :  { %80 = vadd.xlane.f32.xlu1 %v79_v10  ;;  %74 = vadd.xlane.f32.xlu0 %v73_v11  ;;  %v82_v12 = vsel %vm72_vm0, %v71_v5, 0.0  ;;  %v76_v13 = vsel %vm72_vm0, %v69_v7, 0.0  ;;  %v89_v19 = vsel %vm72_vm0, %v85_v15, 0.0  ;;  %v87_v21 = vmul.f32 %v66_v17, %v66_v17  ;;  %p296_p0 = scmp.ne.s32.totalorder %s192_s12, %s295_s16  ;;  %p300_p12 = scmp.lt.s32.totalorder %s192_s12, %s192_s12 }
  0x40   :  { %v92_v18 = vsel %vm72_vm0, %v86_v14, 0.0  ;;  %v98_v22 = vsel %vm72_vm0, %v88_v20, 0.0  ;;  %v102_v24 = vmul.f32 %v65_v8, %v61_v6  ;;  %v105_v27 = vsel %vm72_vm0, %v101_v25, 0.0  ;;  %p301_p13 = scmp.lt.s32.totalorder %s299_s17, %s295_s16 }
  0x41   :  { %v95_v23 = vsel %vm72_vm0, %v87_v21, 0.0  ;;  %v104_v28 = vmul.f32 %v67_v16, %v63_v2  ;;  %v103_v29 = vmul.f32 %v66_v17, %v62_v0  ;;  %v154_v51 = vand.u32 127, %v153_v48 }
  0x42   :  { %v108_v26 = vsel %vm72_vm0, %v102_v24, 0.0  ;;  %v156_v59 = vshrl.u32 %v153_v48, 7  ;;  %vm178_vm3 = vcmask 261312   ;;  %vm181_vm4 = vcmask 253952   ;;  %p302_p1 = por %p301_p13, %p300_p12 }
  0x43   :  { %83 = vadd.xlane.f32.xlu1 %v82_v12  ;;  %77 = vadd.xlane.f32.xlu0 %v76_v13  ;;  %v114_v30 = vsel %vm72_vm0, %v104_v28, 0.0  ;;  %v111_v31 = vsel %vm72_vm0, %v103_v29, 0.0  ;;  %v159_v60 = vadd.s32 4294967288, %v154_v51  ;;  %v173_v4 = vadd.s32 4294967272, %v154_v51 }
  0x44   :  { %v166_v6 = vadd.s32 4294967280, %v154_v51  ;;  %v157_v10 = vsub.s32 %v154_v51, %v156_v59  ;;  %p303_p2 = pnand %p302_p1, %p296_p0 }
  0x45   :  { %v162_v8 = vsub.s32 %v159_v60, %v156_v59  ;;  %v176_v16 = vsub.s32 %v173_v4, %v156_v59 }
  0x47   :  { %93 = vadd.xlane.f32.xlu1 %v92_v18  ;;  %90 = vadd.xlane.f32.xlu0 %v89_v19  ;;  %v169_v18 = vsub.s32 %v166_v6, %v156_v59 }
  0x4b   :  { %99 = vadd.xlane.f32.xlu1 %v98_v22  ;;  %96 = vadd.xlane.f32.xlu0 %v95_v23 }
  0x4f   :  { %109 = vadd.xlane.f32.xlu1 %v108_v26  ;;  %106 = vadd.xlane.f32.xlu0 %v105_v27 }
  0x53   :  { %115 = vadd.xlane.f32.xlu1 %v114_v30  ;;  %112 = vadd.xlane.f32.xlu0 %v111_v31 }
  0xc8   :  { %v81_v32 = vpop.xlane.xlu1 %80  ;;  %v75_v33 = vpop.xlane.xlu0 %74 }
  0xc9   :  { %v117_v36 = vmax.f32 %v75_v33, 1e-24  ;;  %v119_v43 = vmax.f32 %v81_v32, 1e-24 }
  0xcc   :  { %v84_v34 = vpop.xlane.xlu1 %83  ;;  %v78_v35 = vpop.xlane.xlu0 %77 }
  0xcd   :  { %v118_v37 = vmax.f32 %v78_v35, 1e-24  ;;  %v120_v38 = vmax.f32 %v84_v34, 1e-24 }
  0xcf   :  { %227 = vrsqrt.f32 %v118_v37 }
  0xd0   :  { %v94_v39 = vpop.xlane.xlu1 %93  ;;  %v91_v40 = vpop.xlane.xlu0 %90  ;;  %229 = vrsqrt.f32 %v117_v36 }
  0xd1   :  { %v126_v41 = vmax.f32 %v94_v39, 1e-24  ;;  %v125_v42 = vmax.f32 %v91_v40, 1e-24  ;;  %231 = vrsqrt.f32 %v120_v38 }
  0xd3   :  { %233 = vrsqrt.f32 %v126_v41 }
  0xd4   :  { %235 = vrsqrt.f32 %v125_v42  ;;  %v100_v44 = vpop.xlane.xlu1 %99  ;;  %v97_v45 = vpop.xlane.xlu0 %96 }
  0xd5   :  { %v128_v46 = vmax.f32 %v100_v44, 1e-24  ;;  %v127_v47 = vmax.f32 %v97_v45, 1e-24  ;;  %237 = vrsqrt.f32 %v119_v43 }
  0xd7   :  { %239 = vrsqrt.f32 %v128_v46 }
  0xd8   :  { %241 = vrsqrt.f32 %v127_v47  ;;  %v110_v49 = vpop.xlane.xlu1 %109  ;;  %v107_v50 = vpop.xlane.xlu0 %106 }
  0xd9   :  { %v134_v52 = vmul.f32 2.0, %v110_v49  ;;  %v133_v53 = vmul.f32 2.0, %v107_v50 }
  0xdc   :  { %v116_v54 = vpop.xlane.xlu1 %115  ;;  %v228_v55 = vpop.eup %227 }
  0xdd   :  { %v113_v56 = vpop.xlane.xlu0 %112  ;;  %v230_v57 = vpop.eup %229  ;;  %v138_v61 = vmul.f32 %v228_v55, %v134_v52  ;;  %v136_v62 = vmul.f32 2.0, %v116_v54 }
  0xde   :  { %v232_v58 = vpop.eup %231  ;;  %v137_v0 = vmul.f32 %v230_v57, %v133_v53  ;;  %v135_v1 = vmul.f32 2.0, %v113_v56 }
  0xdf   :  { %v140_v11 = vmul.f32 %v232_v58, %v136_v62 }
  0xe0   :  { %v234_v63 = vpop.eup %233 }
  0xe1   :  { %v236_v2 = vpop.eup %235  ;;  %v142_v3 = vmul.f32 %v234_v63, %v138_v61 }
  0xe2   :  { %v141_v5 = vmul.f32 %v236_v2, %v137_v0  ;;  %v238_v7 = vpop.eup %237 }
  0xe3   :  { %v146_v9 = vsub.f32 2.0, %v142_v3  ;;  %v139_v14 = vmul.f32 %v238_v7, %v135_v1 }
  0xe4   :  { %v240_v12 = vpop.eup %239  ;;  %v145_v13 = vsub.f32 2.0, %v141_v5 }
  0xe5   :  { %v242_v15 = vpop.eup %241  ;;  %v144_v17 = vmul.f32 %v240_v12, %v140_v11  ;;  %v163_v20 = vrot.slane %v146_v9, %v162_v8 }
  0xe6   :  { %v143_v19 = vmul.f32 %v242_v15, %v139_v14  ;;  %v158_v21 = vrot.slane %v145_v13, %v157_v10 }
  0xe7   :  { %v148_v22 = vsub.f32 2.0, %v144_v17 }
  0xe8   :  { %v147_v23 = vsub.f32 2.0, %v143_v19  ;;  %v165_v26 = vsel %vm164_vm1, %v163_v20, %v158_v21 }
  0xe9   :  { %v177_v24 = vrot.slane %v148_v22, %v176_v16 }
  0xea   :  { %v170_v25 = vrot.slane %v147_v23, %v169_v18 }
  0xec   :  { %v172_v27 = vsel %vm171_vm2, %v170_v25, %v165_v26 }
  0xed   :  { %v179_v28 = vsel %vm178_vm3, %v177_v24, %v172_v27 }
  0xee   :  { %182 = vst.msk [vmem:[#allocation7] sm:$0x1] %vm181_vm4, %v179_v28 }
  0xef   :  { %306 = shalt.err (!%p303_p2)
}
  0xf0   :  { %s307_s9 = scalar_lea.hbm %s189_s15, 16  ;;  %s309_s20 = scalar_lea.hbm %s416_s2, 16 }
  0xf1   :  { %p308_p3 = scmp.ne.s32.totalorder %s189_s15, %s307_s9  ;;  %p311_p4 = scmp.lt.s32.totalorder %s309_s20, %s307_s9 }
  0xf3   :  { %p313_p5 = pnand %p311_p4, %p308_p3 }
  0xf5   :  { %316 = shalt.err (!%p313_p5)
}
  0xf6   :  { %194 = dma.vmem_to_hbm [thread:$0]  %s192_s12, 16, %s189_s15, [#allocation4]  }
  0xf7   :  { %321 = dma.done.wait [#allocation4], 16  }
  0xf8   :  { %322 = vsyncadd [#allocation4], 4294967280 }
  0xf9   :  { %198 = vsyncpa [#allocation3], 1 }
  0xfa   :  { %199 = vsyncpa [#allocation6], 1 }
  0xfb   :  { %200 = vsyncpa [#allocation4], 1 }

// kernel: tpu_custom_call.1
= control target key start
LH: loop header
LB: loop body
LE: loop exit
PB: predicated region body
PF: predicated region fallthrough
CT: control target
= control target key end

     0   :  { %7 = vsyncpa [#allocation3], 0  ;;  %s307_s0 = inlined_call_operand.hbm [shape: f32[8,32], index: 0, kind: input, shape index: {}]   ;;  %s308_s1 = inlined_call_operand.hbm [shape: f32[8,32], index: 1, kind: input, shape index: {}]   ;;  %s309_s2 = inlined_call_operand.hbm [shape: f32[1,32], index: 2, kind: output, shape index: {}]  }
   0x1   :  { %8 = vsyncpa [#allocation6], 0 }
   0x2   :  { %9 = vsyncpa [#allocation4], 0 }
   0x3   :  { %14 = vsyncadd [#allocation3], 384  ;;  %s266_s9 = smov [#allocation2]  }
   0x4   :  { %s15_s10 = sshll.u32 %s266_s9, 4  ;;  %s16_s10 = int_to_ptr.vmem [resolvable:$true] %s15_s10 }
   0x5   :  { %s208_s11 = scalar_lea.vmem %s16_s10, 128  ;;  %s212_s12 = scalar_lea.vmem %s16_s10, 512 }
   0x6   :  { %p209_p0 = scmp.ne.s32.totalorder %s16_s10, %s208_s11  ;;  %p213_p1 = scmp.lt.s32.totalorder %s16_s10, %s16_s10 }
   0x7   :  { %p214_p2 = scmp.lt.s32.totalorder %s212_s12, %s208_s11 }
   0x9   :  { %p215_p3 = por %p214_p2, %p213_p1 }
   0xb   :  { %p216_p4 = pnand %p215_p3, %p209_p0 }
   0xd   :  { %219 = shalt.err (!%p216_p4)
}
   0xe   :  { %s267_s13 = smov 128   ;;  %s268_s14 = smov 8  }
   0xf   :  { %21 = dma.hbm_to_vmem [thread:$0]  %s307_s0, 128, %s16_s10, [#allocation3], %s267_s13, %s267_s13, %s268_s14  }
  0x10   :  { %26 = vsyncadd [#allocation6], 384  ;;  %s269_s17 = smov [#allocation5]  }
  0x11   :  { %s27_s18 = sshll.u32 %s269_s17, 4  ;;  %s28_s18 = int_to_ptr.vmem [resolvable:$true] %s27_s18 }
  0x12   :  { %s228_s19 = scalar_lea.vmem %s28_s18, 128  ;;  %s232_s20 = scalar_lea.vmem %s28_s18, 512 }
  0x13   :  { %p229_p5 = scmp.ne.s32.totalorder %s28_s18, %s228_s19  ;;  %p233_p6 = scmp.lt.s32.totalorder %s28_s18, %s28_s18 }
  0x14   :  { %p234_p7 = scmp.lt.s32.totalorder %s232_s20, %s228_s19 }
  0x16   :  { %p235_p8 = por %p234_p7, %p233_p6 }
  0x18   :  { %p236_p9 = pnand %p235_p8, %p229_p5 }
  0x1a   :  { %239 = shalt.err (!%p236_p9)
}
  0x1b   :  { %33 = dma.hbm_to_vmem [thread:$0]  %s308_s1, 128, %s28_s18, [#allocation6], %s267_s13, %s267_s13, %s268_s14  }
  0x1c   :  { %260 = dma.done.wait [#allocation3], 512  }
  0x1d   :  { %261 = vsyncadd [#allocation3], 4294966784 }
  0x1e   :  { %262 = dma.done.wait [#allocation6], 512  }
  0x1f   :  { %263 = vsyncadd [#allocation6], 4294966784  ;;  %v42_v0 = vld [vmem:[#allocation2 + $0x10] sm:$0xff]  ;;  %vm52_vm0 = vcmask 261120   ;;  %v40_v1 = vld [vmem:[#allocation2] sm:$0xff]  ;;  %v133_v48 = vlaneseq  ;;  %vm144_vm1 = vcmask 130112  }
  0x20   :  { %v43_v2 = vld [vmem:[#allocation2 + $0x18] sm:$0xff]  ;;  %v50_v3 = vmul.f32 %v42_v0, %v42_v0  ;;  %v48_v4 = vmul.f32 %v40_v1, %v40_v1  ;;  %v41_v6 = vld [vmem:[#allocation2 + $0x8] sm:$0xff]  ;;  %v44_v9 = vld [vmem:[#allocation5] sm:$0xff]  ;;  %vm151_vm2 = vcmask 195712   ;;  %s270_s0 = smov [#allocation7]   ;;  %vm158_vm3 = vcmask 261312  }
  0x21   :  { %v51_v5 = vmul.f32 %v43_v2, %v43_v2  ;;  %v49_v7 = vmul.f32 %v41_v6, %v41_v6  ;;  %v45_v8 = vld [vmem:[#allocation5 + $0x8] sm:$0xff]  ;;  %v65_v15 = vmul.f32 %v44_v9, %v44_v9  ;;  %v47_v16 = vld [vmem:[#allocation5 + $0x18] sm:$0xff]  ;;  %v46_v17 = vld [vmem:[#allocation5 + $0x10] sm:$0xff]  ;;  %v81_v25 = vmul.f32 %v44_v9, %v40_v1  ;;  %s169_s1 = sshll.u32 %s270_s0, 4  ;;  %s170_s1 = int_to_ptr.vmem [resolvable:$true] %s169_s1 }
  0x22   :  { %v59_v10 = vsel %vm52_vm0, %v50_v3, 0.0  ;;  %v53_v11 = vsel %vm52_vm0, %v48_v4, 0.0  ;;  %v66_v14 = vmul.f32 %v45_v8, %v45_v8  ;;  %v68_v20 = vmul.f32 %v47_v16, %v47_v16  ;;  %s240_s23 = scalar_lea.vmem %s170_s1, 16  ;;  %s244_s24 = scalar_lea.vmem %s170_s1, 32 }
  0x23   :  { %60 = vadd.xlane.f32.xlu1 %v59_v10  ;;  %54 = vadd.xlane.f32.xlu0 %v53_v11  ;;  %v62_v12 = vsel %vm52_vm0, %v51_v5, 0.0  ;;  %v56_v13 = vsel %vm52_vm0, %v49_v7, 0.0  ;;  %v69_v19 = vsel %vm52_vm0, %v65_v15, 0.0  ;;  %v67_v21 = vmul.f32 %v46_v17, %v46_v17  ;;  %p241_p10 = scmp.ne.s32.totalorder %s170_s1, %s240_s23  ;;  %p245_p11 = scmp.lt.s32.totalorder %s170_s1, %s170_s1 }
  0x24   :  { %v72_v18 = vsel %vm52_vm0, %v66_v14, 0.0  ;;  %v78_v22 = vsel %vm52_vm0, %v68_v20, 0.0  ;;  %v82_v24 = vmul.f32 %v45_v8, %v41_v6  ;;  %v85_v27 = vsel %vm52_vm0, %v81_v25, 0.0  ;;  %p246_p12 = scmp.lt.s32.totalorder %s244_s24, %s240_s23 }
  0x25   :  { %v75_v23 = vsel %vm52_vm0, %v67_v21, 0.0  ;;  %v84_v28 = vmul.f32 %v47_v16, %v43_v2  ;;  %v83_v29 = vmul.f32 %v46_v17, %v42_v0  ;;  %v134_v51 = vand.u32 127, %v133_v48 }
  0x26   :  { %v88_v26 = vsel %vm52_vm0, %v82_v24, 0.0  ;;  %v136_v59 = vshrl.u32 %v133_v48, 7  ;;  %vm161_vm4 = vcmask 253952   ;;  %p247_p13 = por %p246_p12, %p245_p11 }
  0x27   :  { %63 = vadd.xlane.f32.xlu1 %v62_v12  ;;  %57 = vadd.xlane.f32.xlu0 %v56_v13  ;;  %v94_v30 = vsel %vm52_vm0, %v84_v28, 0.0  ;;  %v91_v31 = vsel %vm52_vm0, %v83_v29, 0.0  ;;  %v139_v60 = vadd.s32 4294967288, %v134_v51  ;;  %v153_v4 = vadd.s32 4294967272, %v134_v51 }
  0x28   :  { %v146_v6 = vadd.s32 4294967280, %v134_v51  ;;  %v137_v10 = vsub.s32 %v134_v51, %v136_v59  ;;  %p248_p0 = pnand %p247_p13, %p241_p10 }
  0x29   :  { %v142_v8 = vsub.s32 %v139_v60, %v136_v59  ;;  %v156_v16 = vsub.s32 %v153_v4, %v136_v59 }
  0x2b   :  { %73 = vadd.xlane.f32.xlu1 %v72_v18  ;;  %70 = vadd.xlane.f32.xlu0 %v69_v19  ;;  %v149_v18 = vsub.s32 %v146_v6, %v136_v59 }
  0x2f   :  { %79 = vadd.xlane.f32.xlu1 %v78_v22  ;;  %76 = vadd.xlane.f32.xlu0 %v75_v23 }
  0x33   :  { %89 = vadd.xlane.f32.xlu1 %v88_v26  ;;  %86 = vadd.xlane.f32.xlu0 %v85_v27 }
  0x37   :  { %95 = vadd.xlane.f32.xlu1 %v94_v30  ;;  %92 = vadd.xlane.f32.xlu0 %v91_v31 }
  0xac   :  { %v61_v32 = vpop.xlane.xlu1 %60  ;;  %v55_v33 = vpop.xlane.xlu0 %54 }
  0xad   :  { %v97_v36 = vmax.f32 %v55_v33, 1e-24  ;;  %v99_v43 = vmax.f32 %v61_v32, 1e-24 }
  0xb0   :  { %v64_v34 = vpop.xlane.xlu1 %63  ;;  %v58_v35 = vpop.xlane.xlu0 %57 }
  0xb1   :  { %v98_v37 = vmax.f32 %v58_v35, 1e-24  ;;  %v100_v38 = vmax.f32 %v64_v34, 1e-24 }
  0xb3   :  { %184 = vrsqrt.f32 %v98_v37 }
  0xb4   :  { %v74_v39 = vpop.xlane.xlu1 %73  ;;  %v71_v40 = vpop.xlane.xlu0 %70  ;;  %186 = vrsqrt.f32 %v97_v36 }
  0xb5   :  { %v106_v41 = vmax.f32 %v74_v39, 1e-24  ;;  %v105_v42 = vmax.f32 %v71_v40, 1e-24  ;;  %188 = vrsqrt.f32 %v100_v38 }
  0xb7   :  { %190 = vrsqrt.f32 %v106_v41 }
  0xb8   :  { %192 = vrsqrt.f32 %v105_v42  ;;  %v80_v44 = vpop.xlane.xlu1 %79  ;;  %v77_v45 = vpop.xlane.xlu0 %76 }
  0xb9   :  { %v108_v46 = vmax.f32 %v80_v44, 1e-24  ;;  %v107_v47 = vmax.f32 %v77_v45, 1e-24  ;;  %194 = vrsqrt.f32 %v99_v43 }
  0xbb   :  { %196 = vrsqrt.f32 %v108_v46 }
  0xbc   :  { %198 = vrsqrt.f32 %v107_v47  ;;  %v90_v49 = vpop.xlane.xlu1 %89  ;;  %v87_v50 = vpop.xlane.xlu0 %86 }
  0xbd   :  { %v114_v52 = vmul.f32 2.0, %v90_v49  ;;  %v113_v53 = vmul.f32 2.0, %v87_v50 }
  0xc0   :  { %v96_v54 = vpop.xlane.xlu1 %95  ;;  %v185_v55 = vpop.eup %184 }
  0xc1   :  { %v93_v56 = vpop.xlane.xlu0 %92  ;;  %v187_v57 = vpop.eup %186  ;;  %v118_v61 = vmul.f32 %v185_v55, %v114_v52  ;;  %v116_v62 = vmul.f32 2.0, %v96_v54 }
  0xc2   :  { %v189_v58 = vpop.eup %188  ;;  %v117_v0 = vmul.f32 %v187_v57, %v113_v53  ;;  %v115_v1 = vmul.f32 2.0, %v93_v56 }
  0xc3   :  { %v120_v11 = vmul.f32 %v189_v58, %v116_v62 }
  0xc4   :  { %v191_v63 = vpop.eup %190 }
  0xc5   :  { %v193_v2 = vpop.eup %192  ;;  %v122_v3 = vmul.f32 %v191_v63, %v118_v61 }
  0xc6   :  { %v121_v5 = vmul.f32 %v193_v2, %v117_v0  ;;  %v195_v7 = vpop.eup %194 }
  0xc7   :  { %v126_v9 = vsub.f32 2.0, %v122_v3  ;;  %v119_v14 = vmul.f32 %v195_v7, %v115_v1 }
  0xc8   :  { %v197_v12 = vpop.eup %196  ;;  %v125_v13 = vsub.f32 2.0, %v121_v5 }
  0xc9   :  { %v199_v15 = vpop.eup %198  ;;  %v124_v17 = vmul.f32 %v197_v12, %v120_v11  ;;  %v143_v20 = vrot.slane %v126_v9, %v142_v8 }
  0xca   :  { %v123_v19 = vmul.f32 %v199_v15, %v119_v14  ;;  %v138_v21 = vrot.slane %v125_v13, %v137_v10 }
  0xcb   :  { %v128_v22 = vsub.f32 2.0, %v124_v17 }
  0xcc   :  { %v127_v23 = vsub.f32 2.0, %v123_v19  ;;  %v145_v26 = vsel %vm144_vm1, %v143_v20, %v138_v21 }
  0xcd   :  { %v157_v24 = vrot.slane %v128_v22, %v156_v16 }
  0xce   :  { %v150_v25 = vrot.slane %v127_v23, %v149_v18 }
  0xd0   :  { %v152_v27 = vsel %vm151_vm2, %v150_v25, %v145_v26 }
  0xd1   :  { %v159_v28 = vsel %vm158_vm3, %v157_v24, %v152_v27 }
  0xd2   :  { %162 = vst.msk [vmem:[#allocation7] sm:$0x1] %vm161_vm4, %v159_v28 }
  0xd3   :  { %251 = shalt.err (!%p248_p0)
}
  0xd4   :  { %172 = dma.vmem_to_hbm [thread:$0]  %s170_s1, 16, %s309_s2, [#allocation4]  }
  0xd5   :  { %264 = dma.done.wait [#allocation4], 16  }
  0xd6   :  { %265 = vsyncadd [#allocation4], 4294967280 }
  0xd7   :  { %176 = vsyncpa [#allocation3], 1 }
  0xd8   :  { %177 = vsyncpa [#allocation6], 1 }
  0xd9   :  { %178 = vsyncpa [#allocation4], 1 }

</bundles_post_ra>
